<compile_context>
chip_gen: v7x
topology: tpu7x:2x2x1
jax: 0.10.0
libtpu: 0.0.40
codegen_flags: <defaults>
</compile_context>

<pallas_src>
import jax
import jax.numpy as jnp
from jax.experimental import pallas as pl
from jax.experimental.pallas import tpu as pltpu

EPS = 1e-5

_MIN_BLOCK_ROWS = 32  # multiple of sublane packing for f32(8)/bf16(16)/int8(32)
_MIB = 1024 * 1024


def _vmem_capacity_bytes():
    try:
        info = pltpu.get_tpu_info()
        cap = getattr(info, "vmem_capacity_bytes", None)
        if cap:
            return int(cap)
    except Exception:
        pass
    return 128 * _MIB  # conservative default (v5e/v6e class)


def _vmem_plan(hidden):
    """Per-generation (tile_budget, vmem_limit, max_block_rows)."""
    cap = _vmem_capacity_bytes()
    if cap >= 128 * _MIB:
        # v5e / v6e: plenty of VMEM, amortize per-step overhead with big tiles.
        max_rows = 2048 if hidden <= 2048 else 1024
        return 64 * _MIB, 96 * _MIB, max_rows
    # v7x (64 MiB physical VMEM): leave headroom, halving rows costs <2% BW.
    return 20 * _MIB, 48 * _MIB, 1024


def layernorm_kernel(x_ref, scale_ref, shift_ref, o_ref):
    # x_ref: (block_rows, hidden); scale/shift: (1, hidden)
    x = x_ref[...].astype(jnp.float32)
    inv_h = jnp.float32(1.0 / x_ref.shape[-1])
    # Single pass over x for both moments (no separate `centered` buffer).
    s = jnp.sum(x, axis=-1, keepdims=True)
    sq = jnp.sum(x * x, axis=-1, keepdims=True)
    mean = s * inv_h
    var = jnp.maximum(sq * inv_h - mean * mean, 0.0)  # guard cancellation
    norm = (x - mean) * jax.lax.rsqrt(var + EPS)
    out = scale_ref[...].astype(jnp.float32) * norm + shift_ref[...].astype(jnp.float32)
    o_ref[...] = out.astype(o_ref.dtype)


def _pick_block_rows(rows, hidden, in_bytes, out_bytes, tile_budget, max_block_rows):
    # Live per-row bytes:
    #   2x double-buffered input tile  + 2x double-buffered output tile
    #   + ~3 block-sized f32 working buffers (x f32 copy, x*x / norm, f32 out).
    bytes_per_row_live = 2 * hidden * (in_bytes + out_bytes) + 3 * hidden * 4
    br = tile_budget // max(bytes_per_row_live, 1)
    br = (br // _MIN_BLOCK_ROWS) * _MIN_BLOCK_ROWS
    br = max(_MIN_BLOCK_ROWS, min(br, max_block_rows))
    # Guarantee >= 2 grid steps when rows permit (keeps both v7x TCs busy).
    half = (rows + 1) // 2
    half_rounded = -(-half // _MIN_BLOCK_ROWS) * _MIN_BLOCK_ROWS
    br = min(br, max(_MIN_BLOCK_ROWS, half_rounded))
    return br


def layer_norm(x, scale, shift):
    """LayerNorm over the last axis of x. scale/shift have shape (hidden,)."""
    orig_shape = x.shape
    hidden = orig_shape[-1]
    rows = 1
    for d in orig_shape[:-1]:
        rows *= d

    x2 = x.reshape(rows, hidden)
    scale2 = scale.reshape(1, hidden)
    shift2 = shift.reshape(1, hidden)

    in_bytes = jnp.dtype(x.dtype).itemsize
    out_bytes = in_bytes
    tile_budget, vmem_limit, max_block_rows = _vmem_plan(hidden)
    block_rows = _pick_block_rows(
        rows, hidden, in_bytes, out_bytes, tile_budget, max_block_rows
    )

    # Ragged last block handled by Pallas (masked DMA); no host-side padding
    # and no output slicing.  Padded rows may compute garbage moments but
    # their stores are masked.
    grid = (pl.cdiv(rows, block_rows),)

    cost = pl.CostEstimate(
        flops=8 * rows * hidden,
        transcendentals=rows,  # one rsqrt per row
        bytes_accessed=rows * hidden * (in_bytes + out_bytes)
        + 2 * hidden * jnp.dtype(scale.dtype).itemsize,
    )

    out = pl.pallas_call(
        layernorm_kernel,
        out_shape=jax.ShapeDtypeStruct((rows, hidden), x.dtype),
        grid_spec=pltpu.PrefetchScalarGridSpec(
            num_scalar_prefetch=0,
            grid=grid,
            in_specs=[
                pl.BlockSpec((block_rows, hidden), lambda i: (i, 0)),
                pl.BlockSpec((1, hidden), lambda i: (0, 0)),
                pl.BlockSpec((1, hidden), lambda i: (0, 0)),
            ],
            out_specs=pl.BlockSpec((block_rows, hidden), lambda i: (i, 0)),
        ),
        compiler_params=pltpu.CompilerParams(
            dimension_semantics=("parallel",),
            vmem_limit_bytes=vmem_limit,
        ),
        cost_estimate=cost,
    )(x2, scale2, shift2)

    return out.reshape(orig_shape)


if __name__ == "__main__":
    key = jax.random.PRNGKey(0)
    batch, seq, hidden = 2, 8, 32
    x = jax.random.normal(key, (batch, seq, hidden), dtype=jnp.float32)

    # Deterministic parameter init matching nn.Parameter(torch.ones/zeros(dim)).
    scale = jnp.ones((hidden,), dtype=jnp.float32)
    shift = jnp.zeros((hidden,), dtype=jnp.float32)

    y = layer_norm(x, scale, shift)
    y = jax.block_until_ready(y)

    # Reference check in plain JAX (population variance, matching unbiased=False).
    mean = jnp.mean(x, axis=-1, keepdims=True)
    var = jnp.mean((x - mean) ** 2, axis=-1, keepdims=True)
    ref = scale * (x - mean) / jnp.sqrt(var + EPS) + shift
    assert jnp.allclose(y, ref, atol=1e-5, rtol=1e-5), "mismatch vs reference"

    print("KERNEL_OK")
</pallas_src>

<mosaic_0001>
module attributes {stable_mosaic.version = 11 : i64} {
  func.func @layernorm_kernel(%arg0: i32, %arg1: memref<32x32xf32, #tpu.memory_space<vmem>>, %arg2: memref<1x32xf32, #tpu.memory_space<vmem>>, %arg3: memref<1x32xf32, #tpu.memory_space<vmem>>, %arg4: memref<32x32xf32, #tpu.memory_space<vmem>>) attributes {dimension_semantics = [#tpu.dimension_semantics<parallel>], iteration_bounds = array<i64: 1>, scalar_prefetch = 0 : i64, scratch_operands = 0 : i64, tpu.core_type = #tpu.core_type<tc>, window_params = [{transform_indices = @transform_0, window_bounds = array<i64: 32, 32>}, {pipeline_mode = #tpu.pipeline_mode<synchronous>, transform_indices = @transform_1, window_bounds = array<i64: 1, 32>}, {pipeline_mode = #tpu.pipeline_mode<synchronous>, transform_indices = @transform_2, window_bounds = array<i64: 1, 32>}, {transform_indices = @transform_3, window_bounds = array<i64: 32, 32>}]} {
    %c0 = arith.constant 0 : index
    %c0_0 = arith.constant 0 : index
    %0 = vector.load %arg1[%c0, %c0_0] : memref<32x32xf32, #tpu.memory_space<vmem>>, vector<32x32xf32>
    %cst = arith.constant dense<0.000000e+00> : vector<32xf32>
    %1 = vector.multi_reduction <add>, %0, %cst [1] : vector<32x32xf32> to vector<32xf32>
    %2 = vector.shape_cast %1 : vector<32xf32> to vector<32x1xf32>
    %3 = arith.mulf %0, %0 : vector<32x32xf32>
    %cst_1 = arith.constant dense<0.000000e+00> : vector<32xf32>
    %4 = vector.multi_reduction <add>, %3, %cst_1 [1] : vector<32x32xf32> to vector<32xf32>
    %5 = vector.shape_cast %4 : vector<32xf32> to vector<32x1xf32>
    %cst_2 = arith.constant 3.125000e-02 : f32
    %6 = vector.broadcast %cst_2 : f32 to vector<32x1xf32>
    %7 = arith.mulf %2, %6 : vector<32x1xf32>
    %cst_3 = arith.constant 3.125000e-02 : f32
    %8 = vector.broadcast %cst_3 : f32 to vector<32x1xf32>
    %9 = arith.mulf %5, %8 : vector<32x1xf32>
    %10 = arith.mulf %7, %7 : vector<32x1xf32>
    %11 = arith.subf %9, %10 : vector<32x1xf32>
    %cst_4 = arith.constant 0.000000e+00 : f32
    %12 = vector.broadcast %cst_4 : f32 to vector<32x1xf32>
    %13 = arith.maximumf %11, %12 : vector<32x1xf32>
    %14 = vector.broadcast %7 : vector<32x1xf32> to vector<32x32xf32>
    %15 = arith.subf %0, %14 : vector<32x32xf32>
    %cst_5 = arith.constant 9.99999974E-6 : f32
    %16 = vector.broadcast %cst_5 : f32 to vector<32x1xf32>
    %17 = arith.addf %13, %16 : vector<32x1xf32>
    %18 = math.rsqrt %17 : vector<32x1xf32>
    %19 = vector.broadcast %18 : vector<32x1xf32> to vector<32x32xf32>
    %20 = arith.mulf %15, %19 : vector<32x32xf32>
    %c0_6 = arith.constant 0 : index
    %c0_7 = arith.constant 0 : index
    %21 = vector.load %arg2[%c0_6, %c0_7] : memref<1x32xf32, #tpu.memory_space<vmem>>, vector<1x32xf32>
    %22 = vector.broadcast %21 : vector<1x32xf32> to vector<32x32xf32>
    %23 = arith.mulf %22, %20 : vector<32x32xf32>
    %c0_8 = arith.constant 0 : index
    %c0_9 = arith.constant 0 : index
    %24 = vector.load %arg3[%c0_8, %c0_9] : memref<1x32xf32, #tpu.memory_space<vmem>>, vector<1x32xf32>
    %25 = vector.broadcast %24 : vector<1x32xf32> to vector<32x32xf32>
    %26 = arith.addf %23, %25 : vector<32x32xf32>
    %c0_10 = arith.constant 0 : index
    %c0_11 = arith.constant 0 : index
    %27 = vector.load %arg4[%c0_10, %c0_11] : memref<32x32xf32, #tpu.memory_space<vmem>>, vector<32x32xf32>
    tpu.vector_store %arg4[%c0_10, %c0_11], %26 {strides = array<i32>} : memref<32x32xf32, #tpu.memory_space<vmem>>, vector<32x32xf32>,
    return
  }
  func.func @transform_0(%arg0: i32) -> (i32, i32) {
    %c0_i32 = arith.constant 0 : i32
    %c0_i32_0 = arith.constant 0 : i32
    return %arg0, %c0_i32 : i32, i32
  }
  func.func @transform_1(%arg0: i32) -> (i32, i32) {
    %c0_i32 = arith.constant 0 : i32
    %c0_i32_0 = arith.constant 0 : i32
    %c0_i32_1 = arith.constant 0 : i32
    return %c0_i32, %c0_i32_0 : i32, i32
  }
  func.func @transform_2(%arg0: i32) -> (i32, i32) {
    %c0_i32 = arith.constant 0 : i32
    %c0_i32_0 = arith.constant 0 : i32
    %c0_i32_1 = arith.constant 0 : i32
    return %c0_i32, %c0_i32_0 : i32, i32
  }
  func.func @transform_3(%arg0: i32) -> (i32, i32) {
    %c0_i32 = arith.constant 0 : i32
    %c0_i32_0 = arith.constant 0 : i32
    return %arg0, %c0_i32 : i32, i32
  }
}

</mosaic_0001>

<bundles_post_ra>
// kernel: tpu_custom_call.1
= control target key start
LH: loop header
LB: loop body
LE: loop exit
PB: predicated region body
PF: predicated region fallthrough
CT: control target
= control target key end

     0   :  { %8 = vsyncpa [#allocation3], 0  ;;  %s393_s0 = inlined_call_operand.hbm [shape: f32[16,32], index: 0, kind: input, shape index: {}]   ;;  %s394_s1 = inlined_call_operand.hbm [shape: f32[1,32], index: 1, kind: input, shape index: {}]   ;;  %s395_s2 = inlined_call_operand.hbm [shape: f32[1,32], index: 2, kind: input, shape index: {}]   ;;  %s396_s3 = inlined_call_operand.hbm [shape: f32[16,32], index: 3, kind: output, shape index: {}]  }
   0x1   :  { %9 = vsyncpa [#allocation6], 0 }
   0x2   :  { %10 = vsyncpa [#allocation4], 0 }
   0x3   :  { %15 = vsyncadd [#allocation3], 256  ;;  %s275_s12 = smov [#allocation5]   ;;  %s276_s14 = smov [#allocation2]  }
   0x4   :  { %s29_s13 = sshll.u32 %s275_s12, 4  ;;  %s16_s15 = sshll.u32 %s276_s14, 4  ;;  %s30_s13 = int_to_ptr.vmem [resolvable:$true] %s29_s13  ;;  %s301_s15 = int_to_ptr.vmem [resolvable:$true] %s16_s15 }
   0x5   :  { %s181_s18 = scalar_lea.hbm %s394_s1, 16 }
   0x6   :  { %p182_p0 = scmp.ne.s32.totalorder %s394_s1, %s181_s18  ;;  %p185_p1 = scmp.lt.u32.totalorder %s181_s18, %s394_s1 }
   0x8   :  { %p187_p2 = pnand %p185_p1, %p182_p0 }
   0xa   :  { %190 = shalt.err (!%p187_p2)
}
   0xb   :  { %s191_s23 = scalar_lea.vmem %s30_s13, 16  ;;  %s195_s24 = scalar_lea.vmem %s30_s13, 32 }
   0xc   :  { %p192_p3 = scmp.ne.s32.totalorder %s30_s13, %s191_s23  ;;  %p196_p4 = scmp.lt.s32.totalorder %s30_s13, %s30_s13 }
   0xd   :  { %p197_p5 = scmp.lt.s32.totalorder %s195_s24, %s191_s23 }
   0xf   :  { %p198_p6 = por %p197_p5, %p196_p4 }
  0x11   :  { %p199_p7 = pnand %p198_p6, %p192_p3 }
  0x13   :  { %202 = shalt.err (!%p199_p7)
}
  0x14   :  { %32 = dma.hbm_to_vmem [thread:$0]  %s394_s1, 16, %s30_s13, [#allocation6]  }
  0x15   :  { %s203_s29 = scalar_lea.hbm %s393_s0, 256 }
  0x16   :  { %p204_p8 = scmp.ne.s32.totalorder %s393_s0, %s203_s29  ;;  %p207_p9 = scmp.lt.u32.totalorder %s203_s29, %s393_s0 }
  0x18   :  { %p209_p10 = pnand %p207_p9, %p204_p8 }
  0x1a   :  { %212 = shalt.err (!%p209_p10)
}
  0x1b   :  { %s213_s7 = scalar_lea.vmem %s301_s15, 256  ;;  %s217_s1 = scalar_lea.vmem %s301_s15, 512 }
  0x1c   :  { %p214_p11 = scmp.ne.s32.totalorder %s301_s15, %s213_s7  ;;  %p218_p12 = scmp.lt.s32.totalorder %s301_s15, %s301_s15 }
  0x1d   :  { %p219_p13 = scmp.lt.s32.totalorder %s217_s1, %s213_s7 }
  0x1f   :  { %p220_p0 = por %p219_p13, %p218_p12 }
  0x21   :  { %p221_p1 = pnand %p220_p0, %p214_p11 }
  0x23   :  { %224 = shalt.err (!%p221_p1)
}
  0x24   :  { %s277_s8 = smov 128   ;;  %s278_s9 = smov 8  }
  0x25   :  { %22 = dma.hbm_to_vmem [thread:$0]  %s393_s0, 256, %s301_s15, [#allocation3], %s277_s8, %s277_s8, %s278_s9  }
  0x26   :  { %s279_s12 = smov [#allocation7]   ;;  %s225_s17 = scalar_lea.hbm %s395_s2, 16 }
  0x27   :  { %s39_s13 = sshll.u32 %s279_s12, 4  ;;  %p226_p2 = scmp.ne.s32.totalorder %s395_s2, %s225_s17  ;;  %s40_s13 = int_to_ptr.vmem [resolvable:$true] %s39_s13 }
  0x28   :  { %p229_p3 = scmp.lt.u32.totalorder %s225_s17, %s395_s2 }
  0x2a   :  { %p231_p4 = pnand %p229_p3, %p226_p2 }
  0x2c   :  { %234 = shalt.err (!%p231_p4)
}
  0x2d   :  { %s235_s22 = scalar_lea.vmem %s40_s13, 16  ;;  %s239_s0 = scalar_lea.vmem %s40_s13, 32 }
  0x2e   :  { %p236_p5 = scmp.ne.s32.totalorder %s40_s13, %s235_s22  ;;  %p240_p6 = scmp.lt.s32.totalorder %s40_s13, %s40_s13 }
  0x2f   :  { %p241_p7 = scmp.lt.s32.totalorder %s239_s0, %s235_s22 }
  0x31   :  { %p242_p8 = por %p241_p7, %p240_p6 }
  0x33   :  { %p243_p9 = pnand %p242_p8, %p236_p5 }
  0x35   :  { %246 = shalt.err (!%p243_p9)
}
  0x36   :  { %42 = dma.hbm_to_vmem [thread:$0]  %s395_s2, 16, %s40_s13, [#allocation6]  }
  0x37   :  { %269 = dma.done.wait [#allocation3], 512  }
  0x38   :  { %270 = vsyncadd [#allocation3], 4294966784 }
  0x39   :  { %271 = dma.done.wait [#allocation6], 32  }
  0x3a   :  { %272 = vsyncadd [#allocation6], 4294967264  ;;  %vm56_vm0 = vcmask 261120   ;;  %v348_v0 = vld [vmem:[#allocation2 + $0x10] sm:$0xff]  ;;  %v350_v1 = vld [vmem:[#allocation2] sm:$0xff] }
  0x3b   :  { %v352_v2 = vld [vmem:[#allocation2 + $0x18] sm:$0xff]  ;;  %v63_v3 = vsel %vm56_vm0, %v348_v0, 0.0  ;;  %v57_v4 = vsel %vm56_vm0, %v350_v1, 0.0  ;;  %v53_v5 = vld [vmem:[#allocation2 + $0x8] sm:$0xff]  ;;  %v69_v9 = vmul.f32 %v350_v1, %v350_v1  ;;  %v71_v13 = vmul.f32 %v348_v0, %v348_v0  ;;  %v165_v51 = vld [vmem:[#allocation5] ss:$0 sm:$0xff] }
  0x3c   :  { %64 = vadd.xlane.f32.xlu1 %v63_v3  ;;  %58 = vadd.xlane.f32.xlu0 %v57_v4  ;;  %v66_v6 = vsel %vm56_vm0, %v352_v2, 0.0  ;;  %v60_v7 = vsel %vm56_vm0, %v53_v5, 0.0  ;;  %v70_v8 = vmul.f32 %v53_v5, %v53_v5  ;;  %v72_v12 = vmul.f32 %v352_v2, %v352_v2  ;;  %v166_v54 = vld [vmem:[#allocation7] ss:$0 sm:$0xff] }
  0x3d   :  { %v73_v11 = vsel %vm56_vm0, %v69_v9, 0.0  ;;  %v79_v15 = vsel %vm56_vm0, %v71_v13, 0.0 }
  0x3e   :  { %v76_v10 = vsel %vm56_vm0, %v70_v8, 0.0  ;;  %v82_v14 = vsel %vm56_vm0, %v72_v12, 0.0 }
  0x40   :  { %67 = vadd.xlane.f32.xlu1 %v66_v6  ;;  %61 = vadd.xlane.f32.xlu0 %v60_v7 }
  0x44   :  { %77 = vadd.xlane.f32.xlu1 %v76_v10  ;;  %74 = vadd.xlane.f32.xlu0 %v73_v11 }
  0x48   :  { %83 = vadd.xlane.f32.xlu1 %v82_v14  ;;  %80 = vadd.xlane.f32.xlu0 %v79_v15 }
  0xc9   :  { %v65_v16 = vpop.xlane.xlu1 %64  ;;  %v59_v17 = vpop.xlane.xlu0 %58 }
  0xca   :  { %v85_v20 = vmul.f32 0.03125, %v59_v17  ;;  %v87_v22 = vmul.f32 0.03125, %v65_v16 }
  0xcc   :  { %v93_v26 = vmul.f32 %v85_v20, %v85_v20  ;;  %v95_v32 = vmul.f32 %v87_v22, %v87_v22  ;;  %v105_v50 = vsub.f32 %v350_v1, %v85_v20  ;;  %v107_v59 = vsub.f32 %v348_v0, %v87_v22 }
  0xcd   :  { %v68_v18 = vpop.xlane.xlu1 %67  ;;  %v62_v19 = vpop.xlane.xlu0 %61 }
  0xce   :  { %v86_v21 = vmul.f32 0.03125, %v62_v19  ;;  %v88_v23 = vmul.f32 0.03125, %v68_v18 }
  0xd0   :  { %v94_v27 = vmul.f32 %v86_v21, %v86_v21  ;;  %v96_v33 = vmul.f32 %v88_v23, %v88_v23  ;;  %v106_v48 = vsub.f32 %v53_v5, %v86_v21  ;;  %v108_v56 = vsub.f32 %v352_v2, %v88_v23 }
  0xd1   :  { %v78_v24 = vpop.xlane.xlu1 %77  ;;  %v75_v25 = vpop.xlane.xlu0 %74 }
  0xd2   :  { %v90_v28 = vmul.f32 0.03125, %v78_v24  ;;  %v89_v29 = vmul.f32 0.03125, %v75_v25 }
  0xd4   :  { %v98_v30 = vsub.f32 %v90_v28, %v94_v27  ;;  %v97_v31 = vsub.f32 %v89_v29, %v93_v26 }
  0xd5   :  { %v84_v34 = vpop.xlane.xlu1 %83  ;;  %v81_v35 = vpop.xlane.xlu0 %80 }
  0xd6   :  { %v102_v36 = vmax.f32 %v98_v30, 0.0  ;;  %v101_v37 = vmax.f32 %v97_v31, 0.0  ;;  %v92_v38 = vmul.f32 0.03125, %v84_v34  ;;  %v91_v39 = vmul.f32 0.03125, %v81_v35 }
  0xd8   :  { %v110_v40 = vadd.f32 1e-05, %v102_v36  ;;  %v109_v41 = vadd.f32 1e-05, %v101_v37  ;;  %v100_v42 = vsub.f32 %v92_v38, %v96_v33  ;;  %v99_v43 = vsub.f32 %v91_v39, %v95_v32 }
  0xda   :  { %173 = vrsqrt.f32 %v110_v40  ;;  %v104_v44 = vmax.f32 %v100_v42, 0.0  ;;  %v103_v45 = vmax.f32 %v99_v43, 0.0 }
  0xdb   :  { %175 = vrsqrt.f32 %v109_v41 }
  0xdc   :  { %v112_v46 = vadd.f32 1e-05, %v104_v44  ;;  %v111_v47 = vadd.f32 1e-05, %v103_v45 }
  0xde   :  { %177 = vrsqrt.f32 %v112_v46 }
  0xdf   :  { %179 = vrsqrt.f32 %v111_v47 }
  0xe4   :  { %v174_v49 = vpop.eup %173 }
  0xe5   :  { %v176_v52 = vpop.eup %175  ;;  %v118_v53 = vmul.f32 %v174_v49, %v106_v48 }
  0xe6   :  { %v117_v55 = vmul.f32 %v176_v52, %v105_v50 }
  0xe7   :  { %v129_v57 = vmul.f32 %v165_v51, %v118_v53 }
  0xe8   :  { %v178_v58 = vpop.eup %177  ;;  %v128_v60 = vmul.f32 %v165_v51, %v117_v55 }
  0xe9   :  { %v180_v61 = vpop.eup %179  ;;  %v140_v62 = vadd.f32 %v166_v54, %v129_v57  ;;  %v120_v63 = vmul.f32 %v178_v58, %v108_v56 }
  0xea   :  { %v139_v3 = vadd.f32 %v166_v54, %v128_v60  ;;  %v119_v4 = vmul.f32 %v180_v61, %v107_v59 }
  0xeb   :  { %144 = vst.msk [vmem:[#allocation8 + $0x8] sm:$0xff] %vm56_vm0, %v140_v62  ;;  %v131_v1 = vmul.f32 %v165_v51, %v120_v63 }
  0xec   :  { %143 = vst.msk [vmem:[#allocation8] sm:$0xff] %vm56_vm0, %v139_v3  ;;  %v130_v5 = vmul.f32 %v165_v51, %v119_v4 }
  0xed   :  { %v142_v6 = vadd.f32 %v166_v54, %v131_v1 }
  0xee   :  { %v141_v7 = vadd.f32 %v166_v54, %v130_v5 }
  0xef   :  { %146 = vst.msk [vmem:[#allocation8 + $0x18] sm:$0xff] %vm56_vm0, %v142_v6 }
  0xf0   :  { %145 = vst.msk [vmem:[#allocation8 + $0x10] sm:$0xff] %vm56_vm0, %v141_v7 }
  0xf1   :  { %151 = vsyncadd [#allocation4], 256  ;;  %s280_s2 = smov [#allocation8]  }
  0xf2   :  { %s152_s24 = sshll.u32 %s280_s2, 4  ;;  %s153_s24 = int_to_ptr.vmem [resolvable:$true] %s152_s24 }
  0xf3   :  { %s247_s25 = scalar_lea.vmem %s153_s24, 256  ;;  %s251_s26 = scalar_lea.vmem %s153_s24, 512 }
  0xf4   :  { %p248_p10 = scmp.ne.s32.totalorder %s153_s24, %s247_s25  ;;  %p252_p11 = scmp.lt.s32.totalorder %s153_s24, %s153_s24 }
  0xf5   :  { %p253_p12 = scmp.lt.s32.totalorder %s251_s26, %s247_s25 }
  0xf7   :  { %p254_p13 = por %p253_p12, %p252_p11 }
  0xf9   :  { %p255_p0 = pnand %p254_p13, %p248_p10 }
  0xfb   :  { %258 = shalt.err (!%p255_p0)
}
  0xfc   :  { %s259_s29 = scalar_lea.hbm %s396_s3, 256 }
  0xfd   :  { %p260_p1 = scmp.ne.s32.totalorder %s396_s3, %s259_s29  ;;  %p263_p2 = scmp.lt.u32.totalorder %s259_s29, %s396_s3 }
  0xff   :  { %p265_p3 = pnand %p263_p2, %p260_p1 }
 0x101   :  { %268 = shalt.err (!%p265_p3)
}
 0x102   :  { %158 = dma.vmem_to_hbm [thread:$0]  %s153_s24, 256, %s396_s3, [#allocation4], %s277_s8, %s277_s8, %s278_s9  }
 0x103   :  { %273 = dma.done.wait [#allocation4], 512  }
 0x104   :  { %274 = vsyncadd [#allocation4], 4294966784 }
 0x105   :  { %162 = vsyncpa [#allocation3], 1 }
 0x106   :  { %163 = vsyncpa [#allocation6], 1 }
 0x107   :  { %164 = vsyncpa [#allocation4], 1 }

</bundles_post_ra>
